<compile_context>
chip_gen: v7x
topology: tpu7x:2x2x1
jax: 0.10.0
libtpu: 0.0.40
codegen_flags: <defaults>
</compile_context>

<pallas_src>
import numpy as np
import jax
import jax.numpy as jnp
from jax.experimental import pallas as pl
from jax.experimental.pallas import tpu as pltpu

BN_EPS = 1e-5


# --------------------------------------------------------------------------
# Parameter folding / packing helpers (wrapper side, plain JAX).
# --------------------------------------------------------------------------
def _fold_conv_bn(w, b, gamma, beta, mean, var):
    """Fold eval-mode BatchNorm1d into the preceding Conv1d.

    w: (Cout, Cin, 3) torch layout -> returns ((3*Cin, Cout), (Cout,)),
    fused-weight row order is [tap k=0 (l-1) | k=1 (l) | k=2 (l+1)] x Cin.
    """
    scale = gamma / jnp.sqrt(var + BN_EPS)                     # (Cout,)
    w_f = w * scale[:, None, None]                             # (Cout, Cin, 3)
    b_f = (b - mean) * scale + beta                            # (Cout,)
    cout, cin, _k = w.shape
    w_k = jnp.transpose(w_f, (2, 1, 0)).reshape(3 * cin, cout)  # row = k*Cin + ci
    return w_k, b_f


# Lane-tight weight-pack geometry: name -> (row0, col0, rows, cols).
# Small blocks share rows by living in different lane ranges.
_SMALL_ROWS = 160


def _weight_offsets(L, C3):
    return {
        "c3": (0, 0, 96, 64),
        "f2": (0, 64, 128, 64),
        "c2": (96, 0, 48, 32),
        "f3": (96, 32, 64, 32),
        "c1": (128, 64, 3, 16),
        "f4": (128, 80, 32, 1),
        "f1": (_SMALL_ROWS, 0, L * C3, 128),
    }


# --------------------------------------------------------------------------
# Forward pass: wrapper builds packed params, Pallas kernel does the math.
# --------------------------------------------------------------------------
def house_price_cnn_forward(x_ncl, p):
    """x_ncl: (B, 1, L) float32 (PyTorch NCW).  Returns (B, 1) float32."""
    B, cin0, L = x_ncl.shape
    assert cin0 == 1
    BL = B * L
    C3 = 64                       # conv3 out channels (fixed by the module)
    f32 = jnp.float32

    # ---- im2col of the Cin=1 input, SEQUENCE-MAJOR rows: r = l*B + b.
    # xcol[r] = [x_{l-1}, x_l, x_{l+1}] of batch element b.
    xs = x_ncl[:, 0, :].astype(f32)                            # (B, L)
    xp = jnp.pad(xs, ((0, 0), (1, 1)))                         # (B, L+2)
    xcol = jnp.stack([xp[:, 0:L], xp[:, 1:L + 1], xp[:, 2:L + 2]], axis=-1)
    xcol = jnp.transpose(xcol, (1, 0, 2)).reshape(BL, 3)       # (L*B, 3)

    # ---- fold BN into conv weights; fuse the 3 taps into one contraction dim
    w1, b1 = _fold_conv_bn(p["c1_w"], p["c1_b"], p["bn1_g"], p["bn1_b"],
                           p["bn1_m"], p["bn1_v"])             # (3,16), (16,)
    w2, b2 = _fold_conv_bn(p["c2_w"], p["c2_b"], p["bn2_g"], p["bn2_b"],
                           p["bn2_m"], p["bn2_v"])             # (48,32), (32,)
    w3, b3 = _fold_conv_bn(p["c3_w"], p["c3_b"], p["bn3_g"], p["bn3_b"],
                           p["bn3_m"], p["bn3_v"])             # (96,64), (64,)

    # ---- FC1 weight: torch flatten order is c*L + l; kernel uses row l*64 + c
    wf1 = jnp.transpose(p["f1_w"].reshape(128, C3, L), (2, 1, 0)).reshape(L * C3, 128)
    wf2 = p["f2_w"].T                                          # (128, 64)
    wf3 = p["f3_w"].T                                          # (64, 32)
    wf4 = p["f4_w"].T                                          # (32, 1)

    # ---- lane-tight pack of all weights into one (R, 128) array (1 DMA)
    woffs = _weight_offsets(L, C3)
    tot_rows = _SMALL_ROWS + L * C3                            # 1184 for L=16
    wpack = jnp.zeros((tot_rows, 128), f32)
    blocks = {"c1": w1, "c2": w2, "c3": w3,
              "f1": wf1, "f2": wf2, "f3": wf3, "f4": wf4}
    for name, arr in blocks.items():
        r0, c0, r, c = woffs[name]
        assert arr.shape == (r, c), (name, arr.shape, (r, c))
        wpack = wpack.at[r0:r0 + r, c0:c0 + c].set(arr.astype(f32))

    # ---- pack all biases into one (8, 128) array (1 DMA)
    biases = [b1, b2, b3, p["f1_b"], p["f2_b"], p["f3_b"], p["f4_b"]]
    bpack = jnp.zeros((8, 128), f32)
    for i, bv in enumerate(biases):
        bpack = bpack.at[i, :bv.shape[0]].set(bv.astype(f32))

    # ----------------------------------------------------------------------
    # Kernel: the whole forward pass, gridless, fully batched.
    # ----------------------------------------------------------------------
    def kernel(xcol_ref, wpack_ref, bpack_ref, o_ref, hs_ref):
        bp = bpack_ref[...]                                    # (8,128) loaded once

        def wblk(name):
            r0, c0, r, c = woffs[name]
            return wpack_ref[r0:r0 + r, c0:c0 + c]

        def relu(v):
            return jnp.maximum(v, 0.0)

        def shifted(h):
            """h: (L*B, C) sequence-major.  Neighbour positions are +/-B rows;
            the zero block IS the l==0 / l==L-1 conv padding (no masks)."""
            c = h.shape[1]
            z = jnp.zeros((B, c), jnp.float32)
            hp = jnp.concatenate([z, h[:BL - B, :]], axis=0)   # position l-1
            hn = jnp.concatenate([h[B:, :], z], axis=0)        # position l+1
            return hp, hn

        # conv1 + BN + ReLU (Cin=1, im2col precomputed): (BL,3)@(3,16)
        h = relu(jnp.dot(xcol_ref[...], wblk("c1"),
                         preferred_element_type=jnp.float32) + bp[0:1, :16])
        # conv2 + BN + ReLU: 3 taps fused -> one (BL,48)@(48,32) matmul
        hp, hn = shifted(h)
        h = relu(jnp.dot(jnp.concatenate([hp, h, hn], axis=1), wblk("c2"),
                         preferred_element_type=jnp.float32) + bp[1:2, :32])
        # conv3 + BN + ReLU: one (BL,96)@(96,64) matmul
        hp, hn = shifted(h)
        h = relu(jnp.dot(jnp.concatenate([hp, h, hn], axis=1), wblk("c3"),
                         preferred_element_type=jnp.float32) + bp[2:3, :64])
        # Dropout(0.3): identity in eval/inference mode.

        # Flatten + Linear(64*L -> 128).  Rows are l*B+b, so batch element b's
        # flattened vector (row order l*64+c, matching wf1) is the lane-concat
        # of the L contiguous (B,64) row groups.  Stage h through a small VMEM
        # scratch and gather the slabs -> flat is (B, L*64) and the matmul LHS
        # has M = B (no block-diagonal expansion, no redundant MXU work).
        hs_ref[...] = h
        flat = jnp.concatenate(
            [hs_ref[l * B:(l + 1) * B, :] for l in range(L)], axis=1)  # (B, L*64)
        y = relu(jnp.dot(flat, wblk("f1"),
                         preferred_element_type=jnp.float32) + bp[3:4, :128])
        # Dropout(0.2): identity in eval/inference mode.

        # FC tail, batched over B.
        y = relu(jnp.dot(y, wblk("f2"),
                         preferred_element_type=jnp.float32) + bp[4:5, :64])
        y = relu(jnp.dot(y, wblk("f3"),
                         preferred_element_type=jnp.float32) + bp[5:6, :32])
        y4 = jnp.dot(y, wblk("f4"),
                     preferred_element_type=jnp.float32) + bp[6:7, :1]   # (B,1)
        # Lane-dense store: broadcast across 128 lanes; wrapper keeps column 0.
        o_ref[...] = jnp.broadcast_to(y4, (B, 128))

    # Gridless call: whole arrays resident in VMEM (<1 MiB total), no pipeline
    # prologue, no double-buffering of the ~0.6 MB weight pack.
    vmem = pl.BlockSpec(memory_space=pltpu.MemorySpace.VMEM)
    out_pad = pl.pallas_call(
        kernel,
        out_shape=jax.ShapeDtypeStruct((B, 128), f32),
        in_specs=[vmem, vmem, vmem],
        out_specs=vmem,
        scratch_shapes=[pltpu.VMEM((BL, C3), f32)],
    )(xcol, wpack, bpack)
    return out_pad[:, :1]


# --------------------------------------------------------------------------
# Pure-JAX reference (mirrors the PyTorch module, eval mode) for validation.
# --------------------------------------------------------------------------
def reference_forward(x_ncl, p):
    x = x_ncl.astype(jnp.float32)
    B, _, L = x.shape
    for c, bn in (("c1", "bn1"), ("c2", "bn2"), ("c3", "bn3")):
        w, b = p[c + "_w"], p[c + "_b"]
        g, be = p[bn + "_g"], p[bn + "_b"]
        m, v = p[bn + "_m"], p[bn + "_v"]
        xp = jnp.pad(x, ((0, 0), (0, 0), (1, 1)))
        y = sum(jnp.einsum("bil,oi->bol", xp[:, :, k:k + L], w[:, :, k])
                for k in range(3)) + b[None, :, None]
        y = (y - m[None, :, None]) / jnp.sqrt(v[None, :, None] + BN_EPS) \
            * g[None, :, None] + be[None, :, None]
        x = jnp.maximum(y, 0.0)
    h = x.reshape(B, -1)                                       # (B, 64*L), c*L+l order
    h = jnp.maximum(h @ p["f1_w"].T + p["f1_b"], 0.0)
    h = jnp.maximum(h @ p["f2_w"].T + p["f2_b"], 0.0)
    h = jnp.maximum(h @ p["f3_w"].T + p["f3_b"], 0.0)
    return h @ p["f4_w"].T + p["f4_b"]


# --------------------------------------------------------------------------
# Deterministic parameter initialization (shapes from the module __init__).
# --------------------------------------------------------------------------
def init_params(key, input_size):
    L = input_size
    ks = jax.random.split(key, 14)

    def nrm(k, shape, fan_in):
        return jax.random.normal(k, shape, jnp.float32) / np.sqrt(fan_in)

    p = {
        "c1_w": nrm(ks[0], (16, 1, 3), 3),   "c1_b": nrm(ks[1], (16,), 3),
        "c2_w": nrm(ks[2], (32, 16, 3), 48), "c2_b": nrm(ks[3], (32,), 48),
        "c3_w": nrm(ks[4], (64, 32, 3), 96), "c3_b": nrm(ks[5], (64,), 96),
        "f1_w": nrm(ks[6], (128, 64 * L), 64 * L), "f1_b": nrm(ks[7], (128,), 64 * L),
        "f2_w": nrm(ks[8], (64, 128), 128),  "f2_b": nrm(ks[9], (64,), 128),
        "f3_w": nrm(ks[10], (32, 64), 64),   "f3_b": nrm(ks[11], (32,), 64),
        "f4_w": nrm(ks[12], (1, 32), 32),    "f4_b": nrm(ks[13], (1,), 32),
    }
    # BatchNorm1d default init + fresh running stats (eval mode).
    for i, c in zip((1, 2, 3), (16, 32, 64)):
        p[f"bn{i}_g"] = jnp.ones((c,), jnp.float32)
        p[f"bn{i}_b"] = jnp.zeros((c,), jnp.float32)
        p[f"bn{i}_m"] = jnp.zeros((c,), jnp.float32)
        p[f"bn{i}_v"] = jnp.ones((c,), jnp.float32)
    return p


if __name__ == "__main__":
    INPUT_SIZE = 16   # sequence length L
    BATCH = 2

    key = jax.random.PRNGKey(0)
    k_params, k_x = jax.random.split(key)
    params = init_params(k_params, INPUT_SIZE)
    x = jax.random.normal(k_x, (BATCH, 1, INPUT_SIZE), jnp.float32)  # NCW like torch

    out = jax.block_until_ready(house_price_cnn_forward(x, params))
    ref = jax.block_until_ready(reference_forward(x, params))

    assert out.shape == (BATCH, 1), out.shape
    # f32 end-to-end: tight tolerance.
    assert np.allclose(np.asarray(out), np.asarray(ref), rtol=1e-4, atol=1e-4), (
        np.asarray(out), np.asarray(ref))

    print("KERNEL_OK")
</pallas_src>

<mosaic_0001>
module attributes {stable_mosaic.version = 11 : i64} {
  func.func @kernel(%arg0: memref<32x3xf32, #tpu.memory_space<vmem>>, %arg1: memref<1184x128xf32, #tpu.memory_space<vmem>>, %arg2: memref<8x128xf32, #tpu.memory_space<vmem>>, %arg3: memref<2x128xf32, #tpu.memory_space<vmem>>, %arg4: memref<32x64xf32, #tpu.memory_space<vmem>>) attributes {dimension_semantics = [], scalar_prefetch = 0 : i64, scratch_operands = 1 : i64, tpu.core_type = #tpu.core_type<tc>} {
    %c0 = arith.constant 0 : index
    %c0_0 = arith.constant 0 : index
    %0 = vector.load %arg2[%c0, %c0_0] : memref<8x128xf32, #tpu.memory_space<vmem>>, vector<8x128xf32>
    %c0_1 = arith.constant 0 : index
    %c0_2 = arith.constant 0 : index
    %1 = vector.load %arg0[%c0_1, %c0_2] : memref<32x3xf32, #tpu.memory_space<vmem>>, vector<32x3xf32>
    %c128 = arith.constant 128 : index
    %c64 = arith.constant 64 : index
    %2 = vector.load %arg1[%c128, %c64] : memref<1184x128xf32, #tpu.memory_space<vmem>>, vector<3x16xf32>
    %cst = arith.constant dense<0.000000e+00> : vector<32x16xf32>
    %3 = tpu.matmul %1, %2, %cst {dimension_numbers = #tpu.dot_dimension_numbers<[1], [0], [0], [1], [0, 0, 1, 1], [], []>} : vector<32x3xf32>, vector<3x16xf32>, vector<32x16xf32> -> vector<32x16xf32>
    %4 = vector.extract_strided_slice %0 {offsets = [0, 0], sizes = [1, 16], strides = [1, 1]} : vector<8x128xf32> to vector<1x16xf32>
    %5 = vector.broadcast %4 : vector<1x16xf32> to vector<32x16xf32>
    %6 = arith.addf %3, %5 : vector<32x16xf32>
    %cst_3 = arith.constant 0.000000e+00 : f32
    %7 = vector.broadcast %cst_3 : f32 to vector<32x16xf32>
    %8 = arith.maximumf %6, %7 : vector<32x16xf32>
    %cst_4 = arith.constant 0.000000e+00 : f32
    %9 = vector.broadcast %cst_4 : f32 to vector<2x16xf32>
    %10 = vector.extract_strided_slice %8 {offsets = [0, 0], sizes = [30, 16], strides = [1, 1]} : vector<32x16xf32> to vector<30x16xf32>
    %11 = tpu.concatenate %9, %10 in 0 : vector<2x16xf32>, vector<30x16xf32> -> vector<32x16xf32>
    %12 = vector.extract_strided_slice %8 {offsets = [2, 0], sizes = [30, 16], strides = [1, 1]} : vector<32x16xf32> to vector<30x16xf32>
    %13 = tpu.concatenate %12, %9 in 0 : vector<30x16xf32>, vector<2x16xf32> -> vector<32x16xf32>
    %14 = tpu.concatenate %11, %8, %13 in 1 : vector<32x16xf32>, vector<32x16xf32>, vector<32x16xf32> -> vector<32x48xf32>
    %c96 = arith.constant 96 : index
    %c0_5 = arith.constant 0 : index
    %15 = vector.load %arg1[%c96, %c0_5] : memref<1184x128xf32, #tpu.memory_space<vmem>>, vector<48x32xf32>
    %cst_6 = arith.constant dense<0.000000e+00> : vector<32x32xf32>
    %16 = tpu.matmul %14, %15, %cst_6 {dimension_numbers = #tpu.dot_dimension_numbers<[1], [0], [0], [1], [0, 0, 1, 1], [], []>} : vector<32x48xf32>, vector<48x32xf32>, vector<32x32xf32> -> vector<32x32xf32>
    %17 = vector.extract_strided_slice %0 {offsets = [1, 0], sizes = [1, 32], strides = [1, 1]} : vector<8x128xf32> to vector<1x32xf32>
    %18 = vector.broadcast %17 : vector<1x32xf32> to vector<32x32xf32>
    %19 = arith.addf %16, %18 : vector<32x32xf32>
    %cst_7 = arith.constant 0.000000e+00 : f32
    %20 = vector.broadcast %cst_7 : f32 to vector<32x32xf32>
    %21 = arith.maximumf %19, %20 : vector<32x32xf32>
    %cst_8 = arith.constant 0.000000e+00 : f32
    %22 = vector.broadcast %cst_8 : f32 to vector<2x32xf32>
    %23 = vector.extract_strided_slice %21 {offsets = [0, 0], sizes = [30, 32], strides = [1, 1]} : vector<32x32xf32> to vector<30x32xf32>
    %24 = tpu.concatenate %22, %23 in 0 : vector<2x32xf32>, vector<30x32xf32> -> vector<32x32xf32>
    %25 = vector.extract_strided_slice %21 {offsets = [2, 0], sizes = [30, 32], strides = [1, 1]} : vector<32x32xf32> to vector<30x32xf32>
    %26 = tpu.concatenate %25, %22 in 0 : vector<30x32xf32>, vector<2x32xf32> -> vector<32x32xf32>
    %27 = tpu.concatenate %24, %21, %26 in 1 : vector<32x32xf32>, vector<32x32xf32>, vector<32x32xf32> -> vector<32x96xf32>
    %c0_9 = arith.constant 0 : index
    %c0_10 = arith.constant 0 : index
    %28 = vector.load %arg1[%c0_9, %c0_10] : memref<1184x128xf32, #tpu.memory_space<vmem>>, vector<96x64xf32>
    %cst_11 = arith.constant dense<0.000000e+00> : vector<32x64xf32>
    %29 = tpu.matmul %27, %28, %cst_11 {dimension_numbers = #tpu.dot_dimension_numbers<[1], [0], [0], [1], [0, 0, 1, 1], [], []>} : vector<32x96xf32>, vector<96x64xf32>, vector<32x64xf32> -> vector<32x64xf32>
    %30 = vector.extract_strided_slice %0 {offsets = [2, 0], sizes = [1, 64], strides = [1, 1]} : vector<8x128xf32> to vector<1x64xf32>
    %31 = vector.broadcast %30 : vector<1x64xf32> to vector<32x64xf32>
    %32 = arith.addf %29, %31 : vector<32x64xf32>
    %cst_12 = arith.constant 0.000000e+00 : f32
    %33 = vector.broadcast %cst_12 : f32 to vector<32x64xf32>
    %34 = arith.maximumf %32, %33 : vector<32x64xf32>
    %c0_13 = arith.constant 0 : index
    %c0_14 = arith.constant 0 : index
    %35 = vector.load %arg4[%c0_13, %c0_14] : memref<32x64xf32, #tpu.memory_space<vmem>>, vector<32x64xf32>
    tpu.vector_store %arg4[%c0_13, %c0_14], %34 {strides = array<i32>} : memref<32x64xf32, #tpu.memory_space<vmem>>, vector<32x64xf32>,
    %c0_15 = arith.constant 0 : index
    %c0_16 = arith.constant 0 : index
    %36 = vector.load %arg4[%c0_15, %c0_16] : memref<32x64xf32, #tpu.memory_space<vmem>>, vector<2x64xf32>
    %c2 = arith.constant 2 : index
    %c0_17 = arith.constant 0 : index
    %37 = vector.load %arg4[%c2, %c0_17] : memref<32x64xf32, #tpu.memory_space<vmem>>, vector<2x64xf32>
    %c4 = arith.constant 4 : index
    %c0_18 = arith.constant 0 : index
    %38 = vector.load %arg4[%c4, %c0_18] : memref<32x64xf32, #tpu.memory_space<vmem>>, vector<2x64xf32>
    %c6 = arith.constant 6 : index
    %c0_19 = arith.constant 0 : index
    %39 = vector.load %arg4[%c6, %c0_19] : memref<32x64xf32, #tpu.memory_space<vmem>>, vector<2x64xf32>
    %c8 = arith.constant 8 : index
    %c0_20 = arith.constant 0 : index
    %40 = vector.load %arg4[%c8, %c0_20] : memref<32x64xf32, #tpu.memory_space<vmem>>, vector<2x64xf32>
    %c10 = arith.constant 10 : index
    %c0_21 = arith.constant 0 : index
    %41 = vector.load %arg4[%c10, %c0_21] : memref<32x64xf32, #tpu.memory_space<vmem>>, vector<2x64xf32>
    %c12 = arith.constant 12 : index
    %c0_22 = arith.constant 0 : index
    %42 = vector.load %arg4[%c12, %c0_22] : memref<32x64xf32, #tpu.memory_space<vmem>>, vector<2x64xf32>
    %c14 = arith.constant 14 : index
    %c0_23 = arith.constant 0 : index
    %43 = vector.load %arg4[%c14, %c0_23] : memref<32x64xf32, #tpu.memory_space<vmem>>, vector<2x64xf32>
    %c16 = arith.constant 16 : index
    %c0_24 = arith.constant 0 : index
    %44 = vector.load %arg4[%c16, %c0_24] : memref<32x64xf32, #tpu.memory_space<vmem>>, vector<2x64xf32>
    %c18 = arith.constant 18 : index
    %c0_25 = arith.constant 0 : index
    %45 = vector.load %arg4[%c18, %c0_25] : memref<32x64xf32, #tpu.memory_space<vmem>>, vector<2x64xf32>
    %c20 = arith.constant 20 : index
    %c0_26 = arith.constant 0 : index
    %46 = vector.load %arg4[%c20, %c0_26] : memref<32x64xf32, #tpu.memory_space<vmem>>, vector<2x64xf32>
    %c22 = arith.constant 22 : index
    %c0_27 = arith.constant 0 : index
    %47 = vector.load %arg4[%c22, %c0_27] : memref<32x64xf32, #tpu.memory_space<vmem>>, vector<2x64xf32>
    %c24 = arith.constant 24 : index
    %c0_28 = arith.constant 0 : index
    %48 = vector.load %arg4[%c24, %c0_28] : memref<32x64xf32, #tpu.memory_space<vmem>>, vector<2x64xf32>
    %c26 = arith.constant 26 : index
    %c0_29 = arith.constant 0 : index
    %49 = vector.load %arg4[%c26, %c0_29] : memref<32x64xf32, #tpu.memory_space<vmem>>, vector<2x64xf32>
    %c28 = arith.constant 28 : index
    %c0_30 = arith.constant 0 : index
    %50 = vector.load %arg4[%c28, %c0_30] : memref<32x64xf32, #tpu.memory_space<vmem>>, vector<2x64xf32>
    %c30 = arith.constant 30 : index
    %c0_31 = arith.constant 0 : index
    %51 = vector.load %arg4[%c30, %c0_31] : memref<32x64xf32, #tpu.memory_space<vmem>>, vector<2x64xf32>
    %52 = tpu.concatenate %36, %37, %38, %39, %40, %41, %42, %43, %44, %45, %46, %47, %48, %49, %50, %51 in 1 : vector<2x64xf32>, vector<2x64xf32>, vector<2x64xf32>, vector<2x64xf32>, vector<2x64xf32>, vector<2x64xf32>, vector<2x64xf32>, vector<2x64xf32>, vector<2x64xf32>, vector<2x64xf32>, vector<2x64xf32>, vector<2x64xf32>, vector<2x64xf32>, vector<2x64xf32>, vector<2x64xf32>, vector<2x64xf32> -> vector<2x1024xf32>
    %c160 = arith.constant 160 : index
    %c0_32 = arith.constant 0 : index
    %53 = vector.load %arg1[%c160, %c0_32] : memref<1184x128xf32, #tpu.memory_space<vmem>>, vector<1024x128xf32>
    %cst_33 = arith.constant dense<0.000000e+00> : vector<2x128xf32>
    %54 = tpu.matmul %52, %53, %cst_33 {dimension_numbers = #tpu.dot_dimension_numbers<[1], [0], [0], [1], [0, 0, 1, 1], [], []>} : vector<2x1024xf32>, vector<1024x128xf32>, vector<2x128xf32> -> vector<2x128xf32>
    %55 = vector.extract_strided_slice %0 {offsets = [3, 0], sizes = [1, 128], strides = [1, 1]} : vector<8x128xf32> to vector<1x128xf32>
    %56 = vector.broadcast %55 : vector<1x128xf32> to vector<2x128xf32>
    %57 = arith.addf %54, %56 : vector<2x128xf32>
    %cst_34 = arith.constant 0.000000e+00 : f32
    %58 = vector.broadcast %cst_34 : f32 to vector<2x128xf32>
    %59 = arith.maximumf %57, %58 : vector<2x128xf32>
    %c0_35 = arith.constant 0 : index
    %c64_36 = arith.constant 64 : index
    %60 = vector.load %arg1[%c0_35, %c64_36] : memref<1184x128xf32, #tpu.memory_space<vmem>>, vector<128x64xf32>
    %cst_37 = arith.constant dense<0.000000e+00> : vector<2x64xf32>
    %61 = tpu.matmul %59, %60, %cst_37 {dimension_numbers = #tpu.dot_dimension_numbers<[1], [0], [0], [1], [0, 0, 1, 1], [], []>} : vector<2x128xf32>, vector<128x64xf32>, vector<2x64xf32> -> vector<2x64xf32>
    %62 = vector.extract_strided_slice %0 {offsets = [4, 0], sizes = [1, 64], strides = [1, 1]} : vector<8x128xf32> to vector<1x64xf32>
    %63 = vector.broadcast %62 : vector<1x64xf32> to vector<2x64xf32>
    %64 = arith.addf %61, %63 : vector<2x64xf32>
    %cst_38 = arith.constant 0.000000e+00 : f32
    %65 = vector.broadcast %cst_38 : f32 to vector<2x64xf32>
    %66 = arith.maximumf %64, %65 : vector<2x64xf32>
    %c96_39 = arith.constant 96 : index
    %c32 = arith.constant 32 : index
    %67 = vector.load %arg1[%c96_39, %c32] : memref<1184x128xf32, #tpu.memory_space<vmem>>, vector<64x32xf32>
    %cst_40 = arith.constant dense<0.000000e+00> : vector<2x32xf32>
    %68 = tpu.matmul %66, %67, %cst_40 {dimension_numbers = #tpu.dot_dimension_numbers<[1], [0], [0], [1], [0, 0, 1, 1], [], []>} : vector<2x64xf32>, vector<64x32xf32>, vector<2x32xf32> -> vector<2x32xf32>
    %69 = vector.extract_strided_slice %0 {offsets = [5, 0], sizes = [1, 32], strides = [1, 1]} : vector<8x128xf32> to vector<1x32xf32>
    %70 = vector.broadcast %69 : vector<1x32xf32> to vector<2x32xf32>
    %71 = arith.addf %68, %70 : vector<2x32xf32>
    %cst_41 = arith.constant 0.000000e+00 : f32
    %72 = vector.broadcast %cst_41 : f32 to vector<2x32xf32>
    %73 = arith.maximumf %71, %72 : vector<2x32xf32>
    %c128_42 = arith.constant 128 : index
    %c80 = arith.constant 80 : index
    %74 = vector.load %arg1[%c128_42, %c80] : memref<1184x128xf32, #tpu.memory_space<vmem>>, vector<32x1xf32>
    %cst_43 = arith.constant dense<0.000000e+00> : vector<2x1xf32>
    %75 = tpu.matmul %73, %74, %cst_43 {dimension_numbers = #tpu.dot_dimension_numbers<[1], [0], [0], [1], [0, 0, 1, 1], [], []>} : vector<2x32xf32>, vector<32x1xf32>, vector<2x1xf32> -> vector<2x1xf32>
    %76 = vector.extract_strided_slice %0 {offsets = [6, 0], sizes = [1, 1], strides = [1, 1]} : vector<8x128xf32> to vector<1x1xf32>
    %77 = vector.broadcast %76 : vector<1x1xf32> to vector<2x1xf32>
    %78 = arith.addf %75, %77 : vector<2x1xf32>
    %79 = vector.shape_cast %78 : vector<2x1xf32> to vector<2x1xf32>
    %80 = vector.broadcast %79 : vector<2x1xf32> to vector<2x128xf32>
    %c0_44 = arith.constant 0 : index
    %c0_45 = arith.constant 0 : index
    %81 = vector.load %arg3[%c0_44, %c0_45] : memref<2x128xf32, #tpu.memory_space<vmem>>, vector<2x128xf32>
    tpu.vector_store %arg3[%c0_44, %c0_45], %80 {strides = array<i32>} : memref<2x128xf32, #tpu.memory_space<vmem>>, vector<2x128xf32>,
    return
  }
}

</mosaic_0001>

<bundles_post_ra>
// kernel: tpu_custom_call.1
= control target key start
LH: loop header
LB: loop body
LE: loop exit
PB: predicated region body
PF: predicated region fallthrough
CT: control target
= control target key end

     0   :  { %8 = vsyncpa [#allocation4], 0  ;;  %s2318_s0 = inlined_call_operand.vmem [shape: f32[32,3], index: 0, kind: input, shape index: {}]   ;;  %s2319_s1 = inlined_call_operand.hbm [shape: f32[1184,128], index: 1, kind: input, shape index: {}]   ;;  %s2320_s2 = inlined_call_operand.vmem [shape: f32[8,128], index: 2, kind: input, shape index: {}]   ;;  %s2321_s3 = inlined_call_operand.hbm [shape: f32[2,128], index: 3, kind: output, shape index: {}]  }
   0x1   :  { %9 = vsyncpa [#allocation5], 0  ;;  %s2052_s12 = smov [#allocation3]   ;;  %s2004_s16 = scalar_lea.hbm %s2319_s1, 18944 }
   0x2   :  { %s17_s13 = sshll.u32 %s2052_s12, 4  ;;  %p2005_p0 = scmp.ne.s32.totalorder %s2319_s1, %s2004_s16  ;;  %s18_s13 = int_to_ptr.vmem [resolvable:$true] %s17_s13 }
   0x3   :  { %p2008_p1 = scmp.lt.u32.totalorder %s2004_s16, %s2319_s1 }
   0x5   :  { %p2010_p2 = pnand %p2008_p1, %p2005_p0 }
   0x7   :  { %2013 = shalt.err (!%p2010_p2)
}
   0x8   :  { %s2014_s21 = scalar_lea.vmem %s18_s13, 18944  ;;  %p2019_p4 = scmp.lt.s32.totalorder %s18_s13, %s18_s13 }
   0x9   :  { %p2015_p3 = scmp.ne.s32.totalorder %s18_s13, %s2014_s21  ;;  %p2020_p5 = scmp.lt.s32.totalorder %s2014_s21, %s2014_s21 }
   0xb   :  { %p2021_p6 = por %p2020_p5, %p2019_p4 }
   0xd   :  { %p2022_p7 = pnand %p2021_p6, %p2015_p3 }
   0xf   :  { %2025 = shalt.err (!%p2022_p7)
}
  0x10   :  { %s2053_s22 = smov 128   ;;  %s2054_s23 = smov 8  }
  0x11   :  { %23 = dma.hbm_to_vmem [thread:$0]  %s2319_s1, 18944, %s18_s13, [#allocation4], %s2053_s22, %s2053_s22, %s2054_s23  }
  0x12   :  { %2048 = dma.done.wait [#allocation4], 18944  }
  0x13   :  { %2049 = vsyncadd [#allocation4], 4294948352  ;;  %vm42_vm0 = vcmask 23552   ;;  %v34_v0 = vld [vmem:[#allocation3 + $0x80] sm:$0x7]  ;;  %v30_v1 = vld [vmem:[%s2318_s0] sm:$0xff]  ;;  %v35_v9 = vlaneseq }
  0x14   :  { %s2055_s28 = smov 64   ;;  %1573 = vmatprep.mubr.msk.f32.mxu1 %vm42_vm0, %v30_v1  ;;  %vm55_vm1 = vcmask 1042432   ;;  %v31_v3 = vld [vmem:[%s2318_s0 + $0x8] sm:$0xff]  ;;  %v32_v4 = vld [vmem:[%s2318_s0 + $0x10] sm:$0xff]  ;;  %v33_v5 = vld [vmem:[%s2318_s0 + $0x18] sm:$0xff]  ;;  %vm164_vm2 = vcmask 1045504  }
  0x15   :  { %40 = vrot.lane.b32.xlu0 %v34_v0, %s2055_s28  ;;  %v2110_v6 = vld [vmem:[#allocation3 + $0x60] sm:$0xff]  ;;  %v2112_v7 = vld [vmem:[#allocation3 + $0x68] sm:$0xff]  ;;  %v2116_v10 = vshrl.u32 %v35_v9, 7  ;;  %v2118_v11 = vld [vmem:[#allocation3 + $0x70] sm:$0xff]  ;;  %s2056_s8 = smov 16   ;;  %vm151_vm3 = vcmask 1041408  }
  0x16   :  { %v1692_v8 = vpack.c.bf16 %v2112_v7, %v2110_v6  ;;  %v2120_v12 = vld [vmem:[#allocation3 + $0x78] sm:$0xff]  ;;  %v213_v16 = vld [vmem:[#allocation3 + $0x80] sm:$0xff]  ;;  %v214_v17 = vld [vmem:[#allocation3 + $0x88] sm:$0xff]  ;;  %s2057_s9 = smov 32   ;;  %vm199_vm4 = vcmask 130048   ;;  %vm204_vm5 = vcmask 261120  }
  0x17   :  { %v1696_v13 = vpack.c.bf16 %v2120_v12, %v2118_v11  ;;  %v37_v14 = vsub.s32 0, %v2116_v10  ;;  %v2128_v15 = vld [vmem:[%s2320_s2] sm:$0xff]  ;;  %v1700_v18 = vpack.c.bf16 %v214_v17, %v213_v16  ;;  %vm219_vm6 = vcmask 392192   ;;  %v2155_v0 = vld [vmem:[#allocation3] sm:$0xff]  ;;  %v2157_v1 = vld [vmem:[#allocation3 + $0x8] sm:$0xff]  ;;  %s2061_s10 = smov 96  }
  0x18   :  { %v2169_v9 = vld [vmem:[#allocation3 + $0x28] sm:$0xff]  ;;  %v2175_v16 = vld [vmem:[#allocation3 + $0x38] sm:$0xff]  ;;  %vm375_vm7 = vcmask 523264   ;;  %vm396_vm8 = vcmask 785408   ;;  %vm2059_vm9 = vmmov 0   ;;  %s2064_s13 = smov [#allocation6]  }
  0x19   :  { %v38_v19 = vrot.slane %v2128_v15, %v37_v14  ;;  %v2173_v14 = vld [vmem:[#allocation3 + $0x30] sm:$0xff]  ;;  %s1345_s14 = sshll.u32 %s2064_s13, 4  ;;  %s1346_s14 = int_to_ptr.vmem [resolvable:$true] %s1345_s14 }
  0x1a   :  { %v1716_v17 = vpack.c.bf16 %v2175_v16, %v2173_v14  ;;  %s2026_s15 = scalar_lea.vmem %s1346_s14, 32  ;;  %p2031_p9 = scmp.lt.s32.totalorder %s1346_s14, %s1346_s14 }
  0x1b   :  { %p2027_p8 = scmp.ne.s32.totalorder %s1346_s14, %s2026_s15  ;;  %p2032_p10 = scmp.lt.s32.totalorder %s2026_s15, %s2026_s15 }
  0x1d   :  { %p2033_p11 = por %p2032_p10, %p2031_p9 }
  0x1f   :  { %p2034_p12 = pnand %p2033_p11, %p2027_p8 }
  0x87   :  { %v41_v2 = vpop.permute.xlu0 %40 }
  0x88   :  { %1571 = vmatprep.subr.msk.mxu1 %vm55_vm1, %v41_v2 }
  0x89   :  { %1572 = vmatpush3.msk.msra.mxu1 %vm55_vm1, %v41_v2  ;;  %v2159_v2 = vld [vmem:[#allocation3 + $0x10] sm:$0xff] }
  0x8a   :  { %1574 = vmatmul.mubr.msk.f32.vlgmr.msra.gmra.mrb[0].mxu1 %vm42_vm0, %v31_v3  ;;  %1693 = vmatprep.subr.bf16.mxu1 %v1692_v8  ;;  %v1704_v3 = vpack.c.bf16 %v2157_v1, %v2155_v0 }
  0x8b   :  { %1576 = vmatprep.mubr.msk.f32.mxu1 %vm42_vm0, %v32_v4  ;;  %1695 = vmatpush3.bf16.msra.mxu1 %v1692_v8  ;;  %v2163_v4 = vld [vmem:[#allocation3 + $0x18] sm:$0xff]  ;;  %v2167_v8 = vld [vmem:[#allocation3 + $0x20] sm:$0xff] }
  0x8c   :  { %1697 = vmatprep.subr.bf16.mxu1 %v1696_v13  ;;  %1705 = vmatprep.subr.bf16.mxu0 %v1704_v3 }
  0x8d   :  { %1707 = vmatpush3.bf16.msra.mxu0 %v1704_v3 }
  0x8e   :  { %1577 = vmatmul.mubr.msk.f32.gmra.mrb[2].mxu1 %vm42_vm0, %v33_v5  ;;  %v1708_v5 = vpack.c.bf16 %v2163_v4, %v2159_v2 }
  0x8f   :  { %1699 = vmatpush3.bf16.msra.mxu1 %v1696_v13  ;;  %v1712_v13 = vpack.c.bf16 %v2169_v9, %v2167_v8 }
  0x90   :  { %1701 = vmatprep.subr.bf16.mxu1 %v1700_v18  ;;  %1709 = vmatprep.subr.bf16.mxu0 %v1708_v5 }
  0x91   :  { %1711 = vmatpush3.bf16.msra.mxu0 %v1708_v5 }
  0x92   :  { %1713 = vmatprep.subr.bf16.mxu0 %v1712_v13 }
  0x93   :  { %1703 = vmatpush3.bf16.msra.mxu1 %v1700_v18  ;;  %v2179_v18 = vld [vmem:[#allocation3 + $0x40] sm:$0xff] }
  0x95   :  { %1715 = vmatpush3.bf16.msra.mxu0 %v1712_v13 }
  0x96   :  { %1717 = vmatprep.subr.bf16.mxu0 %v1716_v17 }
  0x99   :  { %1719 = vmatpush3.bf16.msra.mxu0 %v1716_v17 }
 0x15d   :  { %v1575_v20 = vpop.f32.mrb[0].mxu1 }
 0x15e   :  { %v130_v21 = vadd.f32 %v1575_v20, %v38_v19  ;;  %v124_v22 = vpop.f32.mrb[1].mxu1 }
 0x15f   :  { %v125_v23 = vadd.f32 %v124_v22, %v38_v19  ;;  %v2186_v22 = vld [vmem:[#allocation3 + $0x50] sm:$0xff] }
 0x160   :  { %v144_v24 = vmax.f32 %v130_v21, 0.0  ;;  %v217_v21 = vsub.s32 1, %v2116_v10 }
 0x161   :  { %v143_v25 = vmax.f32 %v125_v23, 0.0  ;;  %v1578_v26 = vpop.f32.mrb[2].mxu1  ;;  %v2188_v23 = vld [vmem:[#allocation3 + $0x58] sm:$0xff] }
 0x162   :  { %v153_v27 = vrot.slane %v144_v24, 6  ;;  %v166_v28 = vrot.slane %v144_v24, 2  ;;  %v140_v29 = vadd.f32 %v1578_v26, %v38_v19  ;;  %v134_v30 = vpop.f32.mrb[3].mxu1  ;;  %176 = vrot.lane.b32.xlu1 %v144_v24, %s2056_s8  ;;  %v1724_v24 = vpack.c.bf16 %v2188_v23, %v2186_v22 }
 0x163   :  { %v152_v31 = vrot.slane %v143_v25, 6  ;;  %v165_v32 = vrot.slane %v143_v25, 2  ;;  %v135_v33 = vadd.f32 %v134_v30, %v38_v19  ;;  %174 = vrot.lane.b32.xlu0 %v143_v25, %s2056_s8  ;;  %v2181_v19 = vld [vmem:[#allocation3 + $0x48] sm:$0xff]  ;;  %v218_v25 = vrot.slane %v2128_v15, %v217_v21 }
 0x164   :  { %v146_v34 = vmax.f32 %v140_v29, 0.0  ;;  %v1720_v20 = vpack.c.bf16 %v2181_v19, %v2179_v18 }
 0x165   :  { %v145_v35 = vmax.f32 %v135_v33, 0.0  ;;  %v167_v36 = vsel %vm164_vm2, %v165_v32, %v166_v28  ;;  %v154_v37 = vsel %vm151_vm3, %v152_v31, %v153_v27  ;;  %v163_v49 = vsel %vm151_vm3, 0.0, %v152_v31 }
 0x166   :  { %v157_v38 = vrot.slane %v146_v34, 6  ;;  %v170_v39 = vrot.slane %v146_v34, 2  ;;  %187 = vrot.lane.b32.xlu1 %v167_v36, %s2057_s9  ;;  %1721 = vmatprep.subr.bf16.mxu0 %v1720_v20 }
 0x167   :  { %v155_v40 = vrot.slane %v145_v35, 6  ;;  %v168_v41 = vrot.slane %v145_v35, 2  ;;  %180 = vrot.lane.b32.xlu0 %v146_v34, %s2056_s8  ;;  %1723 = vmatpush3.bf16.msra.mxu0 %v1720_v20 }
 0x168   :  { %v173_v46 = vsel %vm164_vm2, %v170_v39, 0.0  ;;  %1725 = vmatprep.subr.bf16.mxu0 %v1724_v24 }
 0x169   :  { %v169_v42 = vsel %vm164_vm2, %v166_v28, %v168_v41  ;;  %v171_v43 = vsel %vm164_vm2, %v168_v41, %v170_v39  ;;  %v158_v44 = vsel %vm151_vm3, %v155_v40, %v157_v38  ;;  %v156_v45 = vsel %vm151_vm3, %v153_v27, %v155_v40 }
 0x16a   :  { %178 = vrot.lane.b32.xlu1 %v145_v35, %s2056_s8 }
 0x16b   :  { %189 = vrot.lane.b32.xlu0 %v169_v42, %s2057_s9  ;;  %1727 = vmatpush3.bf16.msra.mxu0 %v1724_v24  ;;  %v606_v24 = vld [vmem:[#allocation3 + $0x220] sm:$0xff] }
 0x16e   :  { %191 = vrot.lane.b32.xlu1 %v171_v43, %s2057_s9 }
 0x16f   :  { %193 = vrot.lane.b32.xlu0 %v173_v46, %s2057_s9 }
 0x1d4   :  { %v177_v47 = vpop.permute.xlu1 %176 }
 0x1d5   :  { %v175_v48 = vpop.permute.xlu0 %174  ;;  %v201_v55 = vsel %vm199_vm4, %v154_v37, %v177_v47 }
 0x1d6   :  { %v200_v50 = vsel %vm199_vm4, %v163_v49, %v175_v48 }
 0x1d8   :  { %v188_v51 = vpop.permute.xlu1 %187 }
 0x1d9   :  { %v205_v52 = vsel %vm204_vm5, %v200_v50, %v188_v51  ;;  %v181_v53 = vpop.permute.xlu0 %180 }
 0x1da   :  { %1591 = vmatprep.mubr.msk.f32.mxu1 %vm219_vm6, %v205_v52  ;;  %v203_v60 = vsel %vm199_vm4, %v158_v44, %v181_v53 }
 0x1dc   :  { %v179_v54 = vpop.permute.xlu1 %178 }
 0x1dd   :  { %v190_v56 = vpop.permute.xlu0 %189  ;;  %v202_v58 = vsel %vm199_vm4, %v156_v45, %v179_v54 }
 0x1de   :  { %v206_v57 = vsel %vm204_vm5, %v201_v55, %v190_v56 }
 0x1df   :  { %1592 = vmatmul.mubr.msk.f32.vlgmr.msra.gmra.mrb[4].mxu1 %vm219_vm6, %v206_v57 }
 0x1e0   :  { %v192_v59 = vpop.permute.xlu1 %191 }
 0x1e1   :  { %v207_v61 = vsel %vm204_vm5, %v202_v58, %v192_v59  ;;  %v194_v62 = vpop.permute.xlu0 %193 }
 0x1e2   :  { %v208_v63 = vsel %vm204_vm5, %v203_v60, %v194_v62  ;;  %1594 = vmatprep.mubr.msk.f32.mxu1 %vm219_vm6, %v207_v61 }
 0x1e3   :  { %1595 = vmatmul.mubr.msk.f32.gmra.mrb[6].mxu1 %vm219_vm6, %v208_v63 }
 0x2b2   :  { %v1593_v26 = vpop.f32.mrb[4].mxu1 }
 0x2b3   :  { %v304_v27 = vadd.f32 %v1593_v26, %v218_v25  ;;  %v298_v28 = vpop.f32.mrb[5].mxu1  ;;  %v574_v26 = vld [vmem:[#allocation3 + $0x120] sm:$0xff] }
 0x2b4   :  { %v299_v29 = vadd.f32 %v298_v28, %v218_v25  ;;  %v575_v28 = vld [vmem:[#allocation3 + $0x128] sm:$0xff] }
 0x2b5   :  { %v318_v30 = vmax.f32 %v304_v27, 0.0 }
 0x2b6   :  { %v317_v31 = vmax.f32 %v299_v29, 0.0  ;;  %v1596_v32 = vpop.f32.mrb[6].mxu1  ;;  %v590_v29 = vld [vmem:[#allocation3 + $0x1a0] sm:$0xff] }
 0x2b7   :  { %v326_v33 = vrot.slane %v318_v30, 6  ;;  %v338_v34 = vrot.slane %v318_v30, 2  ;;  %v314_v35 = vadd.f32 %v1596_v32, %v218_v25  ;;  %348 = vrot.lane.b32.xlu0 %v318_v30, %s2057_s9  ;;  %v308_v36 = vpop.f32.mrb[7].mxu1  ;;  %v591_v30 = vld [vmem:[#allocation3 + $0x1a8] sm:$0xff] }
 0x2b8   :  { %v325_v37 = vrot.slane %v317_v31, 6  ;;  %v337_v38 = vrot.slane %v317_v31, 2  ;;  %v309_v39 = vadd.f32 %v308_v36, %v218_v25  ;;  %346 = vrot.lane.b32.xlu1 %v317_v31, %s2057_s9  ;;  %v607_v25 = vld [vmem:[#allocation3 + $0x228] sm:$0xff]  ;;  %v1728_v31 = vpack.c.bf16 %v575_v28, %v574_v26  ;;  %v582_v26 = vld [vmem:[#allocation3 + $0x160] sm:$0xff] }
 0x2b9   :  { %v320_v40 = vmax.f32 %v314_v35, 0.0  ;;  %v1760_v27 = vpack.c.bf16 %v607_v25, %v606_v24  ;;  %v1762_v32 = vpack.c.bf16 %v591_v30, %v590_v29  ;;  %v608_v35 = vld [vmem:[#allocation3 + $0x230] sm:$0xff]  ;;  %v614_v24 = vld [vmem:[#allocation3 + $0x260] sm:$0xff]  ;;  %v615_v25 = vld [vmem:[#allocation3 + $0x268] sm:$0xff] }
 0x2ba   :  { %v319_v41 = vmax.f32 %v309_v39, 0.0  ;;  %v339_v42 = vsel %vm164_vm2, %v337_v38, %v338_v34  ;;  %v327_v43 = vsel %vm151_vm3, %v325_v37, %v326_v33  ;;  %v336_v55 = vsel %vm151_vm3, 0.0, %v325_v37  ;;  %v609_v37 = vld [vmem:[#allocation3 + $0x238] sm:$0xff]  ;;  %v576_v38 = vld [vmem:[#allocation3 + $0x130] sm:$0xff]  ;;  %1729 = vmatprep.subr.bf16.mxu1 %v1728_v31  ;;  %v598_v31 = vld [vmem:[#allocation3 + $0x1e0] sm:$0xff] }
 0x2bb   :  { %v330_v44 = vrot.slane %v320_v40, 6  ;;  %v342_v45 = vrot.slane %v320_v40, 2  ;;  %1761 = vmatprep.subr.bf16.mxu0 %v1760_v27  ;;  %v577_v39 = vld [vmem:[#allocation3 + $0x138] sm:$0xff]  ;;  %v583_v27 = vld [vmem:[#allocation3 + $0x168] sm:$0xff]  ;;  %v1776_v30 = vpack.c.bf16 %v615_v25, %v614_v24 }
 0x2bc   :  { %v328_v46 = vrot.slane %v319_v41, 6  ;;  %v340_v47 = vrot.slane %v319_v41, 2  ;;  %359 = vrot.lane.b32.xlu1 %v339_v42, %s2055_s28  ;;  %v592_v42 = vld [vmem:[#allocation3 + $0x1b0] sm:$0xff] }
 0x2bd   :  { %v345_v52 = vsel %vm164_vm2, %v342_v45, 0.0 }
 0x2be   :  { %v341_v48 = vsel %vm164_vm2, %v338_v34, %v340_v47  ;;  %v343_v49 = vsel %vm164_vm2, %v340_v47, %v342_v45  ;;  %v329_v50 = vsel %vm151_vm3, %v326_v33, %v328_v46  ;;  %v331_v51 = vsel %vm151_vm3, %v328_v46, %v330_v44  ;;  %v558_v33 = vld [vmem:[#allocation3 + $0xa0] sm:$0xff]  ;;  %v559_v34 = vld [vmem:[#allocation3 + $0xa8] sm:$0xff]  ;;  %v560_v44 = vld [vmem:[#allocation3 + $0xb0] sm:$0xff] }
 0x2bf   :  { %361 = vrot.lane.b32.xlu0 %v341_v48, %s2055_s28  ;;  %v1730_v36 = vpack.c.bf16 %v559_v34, %v558_v33  ;;  %v561_v46 = vld [vmem:[#allocation3 + $0xb8] sm:$0xff]  ;;  %v610_v47 = vld [vmem:[#allocation3 + $0x240] sm:$0xff]  ;;  %v611_v48 = vld [vmem:[#allocation3 + $0x248] sm:$0xff]  ;;  %v1744_v34 = vpack.c.bf16 %v583_v27, %v582_v26 }
 0x2c0   :  { %350 = vrot.lane.b32.xlu1 %v319_v41, %s2057_s9  ;;  %v1732_v41 = vpack.c.bf16 %v577_v39, %v576_v38  ;;  %v566_v33 = vld [vmem:[#allocation3 + $0xe0] sm:$0xff]  ;;  %v584_v38 = vld [vmem:[#allocation3 + $0x170] sm:$0xff]  ;;  %v585_v39 = vld [vmem:[#allocation3 + $0x178] sm:$0xff] }
 0x2c1   :  { %1731 = vmatpush3.bf16.msra.mxu1 %v1730_v36  ;;  %v616_v36 = vld [vmem:[#allocation3 + $0x270] sm:$0xff]  ;;  %v605_v26 = vld [vmem:[#allocation3 + $0x218] sm:$0xff] }
 0x2c2   :  { %1733 = vmatprep.subr.bf16.mxu1 %v1732_v41  ;;  %v572_v27 = vld [vmem:[#allocation3 + $0x110] sm:$0xff] }
 0x2c3   :  { %352 = vrot.lane.b32.xlu0 %v320_v40, %s2057_s9  ;;  %v1764_v40 = vpack.c.bf16 %v609_v37, %v608_v35  ;;  %v567_v35 = vld [vmem:[#allocation3 + $0xe8] sm:$0xff]  ;;  %v617_v37 = vld [vmem:[#allocation3 + $0x278] sm:$0xff] }
 0x2c4   :  { %363 = vrot.lane.b32.xlu1 %v343_v49, %s2055_s28  ;;  %v1734_v49 = vpack.c.bf16 %v561_v46, %v560_v44  ;;  %v1746_v41 = vpack.c.bf16 %v567_v35, %v566_v33  ;;  %v601_v44 = vld [vmem:[#allocation3 + $0x1f8] sm:$0xff]  ;;  %v1748_v46 = vpack.c.bf16 %v585_v39, %v584_v38  ;;  %v670_v35 = vld [vmem:[#allocation3 + $0x420] sm:$0xff]  ;;  %v639_v39 = vld [vmem:[#allocation3 + $0x328] sm:$0xff] }
 0x2c5   :  { %v638_v38 = vld [vmem:[#allocation3 + $0x320] sm:$0xff] }
 0x2c6   :  { %1735 = vmatpush3.bf16.msra.mxu1 %v1734_v49  ;;  %v619_v49 = vld [vmem:[#allocation3 + $0x288] sm:$0xff] }
 0x2c7   :  { %365 = vrot.lane.b32.xlu0 %v345_v52, %s2055_s28  ;;  %v579_v52 = vld [vmem:[#allocation3 + $0x148] sm:$0xff] }
 0x329   :  { %v349_v54 = vpop.permute.xlu0 %348 }
 0x32a   :  { %v347_v53 = vpop.permute.xlu1 %346  ;;  %v372_v59 = vsel %vm204_vm5, %v327_v43, %v349_v54  ;;  %v593_v43 = vld [vmem:[#allocation3 + $0x1b8] sm:$0xff] }
 0x32b   :  { %v371_v56 = vsel %vm204_vm5, %v336_v55, %v347_v53  ;;  %v1766_v45 = vpack.c.bf16 %v593_v43, %v592_v42  ;;  %v594_v53 = vld [vmem:[#allocation3 + $0x1c0] sm:$0xff]  ;;  %v595_v55 = vld [vmem:[#allocation3 + $0x1c8] sm:$0xff]  ;;  %v1780_v42 = vpack.c.bf16 %v617_v37, %v616_v36  ;;  %v600_v43 = vld [vmem:[#allocation3 + $0x1f0] sm:$0xff] }
 0x32c   :  { %v671_v36 = vld [vmem:[#allocation3 + $0x428] sm:$0xff] }
 0x32d   :  { %v1824_v37 = vpack.c.bf16 %v671_v36, %v670_v35  ;;  %v674_v35 = vld [vmem:[#allocation3 + $0x440] sm:$0xff]  ;;  %v675_v36 = vld [vmem:[#allocation3 + $0x448] sm:$0xff] }
 0x32e   :  { %v360_v57 = vpop.permute.xlu1 %359 }
 0x32f   :  { %v376_v58 = vsel %vm375_vm7, %v371_v56, %v360_v57  ;;  %v562_v56 = vld [vmem:[#allocation3 + $0xc0] sm:$0xff]  ;;  %v563_v57 = vld [vmem:[#allocation3 + $0xc8] sm:$0xff] }
 0x330   :  { %1621 = vmatprep.mubr.msk.f32.mxu0 %vm396_vm8, %v376_v58  ;;  %v1770_v58 = vpack.c.bf16 %v595_v55, %v594_v53  ;;  %v602_v55 = vld [vmem:[#allocation3 + $0x200] sm:$0xff] }
 0x331   :  { %v362_v60 = vpop.permute.xlu0 %361 }
 0x332   :  { %v377_v61 = vsel %vm375_vm7, %v372_v59, %v362_v60  ;;  %v351_v62 = vpop.permute.xlu1 %350  ;;  %v612_v59 = vld [vmem:[#allocation3 + $0x250] sm:$0xff]  ;;  %v613_v60 = vld [vmem:[#allocation3 + $0x258] sm:$0xff] }
 0x333   :  { %1622 = vmatmul.mubr.msk.f32.vlgmr.msra.gmra.mrb[0].mxu0 %vm396_vm8, %v377_v61  ;;  %v373_v3 = vsel %vm204_vm5, %v329_v50, %v351_v62  ;;  %v1768_v50 = vpack.c.bf16 %v611_v48, %v610_v47  ;;  %v580_v61 = vld [vmem:[#allocation3 + $0x150] sm:$0xff]  ;;  %v1738_v62 = vpack.c.bf16 %v563_v57, %v562_v56  ;;  %v569_v47 = vld [vmem:[#allocation3 + $0xf8] sm:$0xff]  ;;  %v618_v48 = vld [vmem:[#allocation3 + $0x280] sm:$0xff] }
 0x334   :  { %1763 = vmatpush3.bf16.msra.mxu0 %v1762_v32  ;;  %v599_v32 = vld [vmem:[#allocation3 + $0x1e8] sm:$0xff]  ;;  %v570_v57 = vld [vmem:[#allocation3 + $0x100] sm:$0xff] }
 0x335   :  { %v353_v63 = vpop.permute.xlu0 %352  ;;  %1765 = vmatprep.subr.bf16.mxu0 %v1764_v40  ;;  %v1778_v40 = vpack.c.bf16 %v599_v32, %v598_v31  ;;  %v603_v56 = vld [vmem:[#allocation3 + $0x208] sm:$0xff] }
 0x336   :  { %v364_v5 = vpop.permute.xlu1 %363  ;;  %v374_v17 = vsel %vm204_vm5, %v331_v51, %v353_v63  ;;  %v578_v51 = vld [vmem:[#allocation3 + $0x140] sm:$0xff]  ;;  %v1772_v63 = vpack.c.bf16 %v613_v60, %v612_v59  ;;  %v571_v59 = vld [vmem:[#allocation3 + $0x108] sm:$0xff]  ;;  %v620_v60 = vld [vmem:[#allocation3 + $0x290] sm:$0xff] }
 0x337   :  { %v378_v13 = vsel %vm375_vm7, %v373_v3, %v364_v5  ;;  %v1736_v54 = vpack.c.bf16 %v579_v52, %v578_v51  ;;  %v581_v3 = vld [vmem:[#allocation3 + $0x158] sm:$0xff]  ;;  %v596_v5 = vld [vmem:[#allocation3 + $0x1d0] sm:$0xff]  ;;  %v587_v51 = vld [vmem:[#allocation3 + $0x188] sm:$0xff]  ;;  %v1782_v52 = vpack.c.bf16 %v601_v44, %v600_v43 }
 0x338   :  { %1624 = vmatprep.mubr.msk.f32.mxu0 %vm396_vm8, %v378_v13  ;;  %1767 = vmatpush3.bf16.msra.mxu0 %v1766_v45  ;;  %v597_v13 = vld [vmem:[#allocation3 + $0x1d8] sm:$0xff]  ;;  %v568_v45 = vld [vmem:[#allocation3 + $0xf0] sm:$0xff] }
 0x339   :  { %v366_v20 = vpop.permute.xlu0 %365  ;;  %1769 = vmatprep.subr.bf16.mxu0 %v1768_v50  ;;  %1737 = vmatprep.subr.bf16.mxu1 %v1736_v54  ;;  %v1774_v28 = vpack.c.bf16 %v597_v13, %v596_v5  ;;  %v586_v50 = vld [vmem:[#allocation3 + $0x180] sm:$0xff]  ;;  %v1750_v53 = vpack.c.bf16 %v569_v47, %v568_v45  ;;  %v1784_v54 = vpack.c.bf16 %v619_v49, %v618_v48  ;;  %v394_v5 = vsub.s32 2, %v2116_v10 }
 0x33a   :  { %v379_v21 = vsel %vm375_vm7, %v374_v17, %v366_v20  ;;  %v1740_v17 = vpack.c.bf16 %v581_v3, %v580_v61  ;;  %v564_v20 = vld [vmem:[#allocation3 + $0xd0] sm:$0xff]  ;;  %1739 = vmatpush3.bf16.msra.mxu1 %v1738_v62  ;;  %v621_v61 = vld [vmem:[#allocation3 + $0x298] sm:$0xff]  ;;  %v1786_v62 = vpack.c.bf16 %v603_v56, %v602_v55 }
 0x33b   :  { %1625 = vmatmul.mubr.msk.f32.gmra.mrb[2].mxu0 %vm396_vm8, %v379_v21  ;;  %v565_v21 = vld [vmem:[#allocation3 + $0xd8] sm:$0xff]  ;;  %v1788_v3 = vpack.c.bf16 %v621_v61, %v620_v60  ;;  %v395_v13 = vrot.slane %v2128_v15, %v394_v5  ;;  %v1936_v60 = vpack.i.bf16 %v2163_v4, %v2159_v2  ;;  %v1941_v61 = vpack.i.bf16 %v2169_v9, %v2167_v8  ;;  %v654_v8 = vld [vmem:[#allocation3 + $0x3a0] sm:$0xff]  ;;  %v655_v9 = vld [vmem:[#allocation3 + $0x3a8] sm:$0xff] }
 0x33c   :  { %1771 = vmatpush3.bf16.msra.mxu0 %v1770_v58  ;;  %v1742_v29 = vpack.c.bf16 %v565_v21, %v564_v20  ;;  %1741 = vmatprep.subr.bf16.mxu1 %v1740_v17  ;;  %v1752_v58 = vpack.c.bf16 %v587_v51, %v586_v50  ;;  %v588_v17 = vld [vmem:[#allocation3 + $0x190] sm:$0xff]  ;;  %v589_v20 = vld [vmem:[#allocation3 + $0x198] sm:$0xff]  ;;  %v1961_v2 = vpack.i.bf16 %v2112_v7, %v2110_v6 }
 0x33d   :  { %1773 = vmatprep.subr.bf16.mxu0 %v1772_v63  ;;  %v1754_v63 = vpack.c.bf16 %v571_v59, %v570_v57  ;;  %v604_v21 = vld [vmem:[#allocation3 + $0x210] sm:$0xff]  ;;  %v1756_v25 = vpack.c.bf16 %v589_v20, %v588_v17  ;;  %v1931_v59 = vpack.i.bf16 %v2157_v1, %v2155_v0  ;;  %v1951_v0 = vpack.i.bf16 %v2181_v19, %v2179_v18  ;;  %v623_v18 = vld [vmem:[#allocation3 + $0x2a8] sm:$0xff]  ;;  %v641_v6 = vld [vmem:[#allocation3 + $0x338] sm:$0xff] }
 0x33e   :  { %1743 = vmatpush3.bf16.msra.mxu1 %v1742_v29  ;;  %v1790_v31 = vpack.c.bf16 %v605_v26, %v604_v21  ;;  %v1956_v1 = vpack.i.bf16 %v2188_v23, %v2186_v22  ;;  %v1966_v4 = vpack.i.bf16 %v2120_v12, %v2118_v11  ;;  %v672_v19 = vld [vmem:[#allocation3 + $0x430] sm:$0xff]  ;;  %v673_v22 = vld [vmem:[#allocation3 + $0x438] sm:$0xff]  ;;  %v1826_v20 = vpack.c.bf16 %v655_v9, %v654_v8  ;;  %v679_v8 = vld [vmem:[#allocation3 + $0x468] sm:$0xff] }
 0x33f   :  { %1745 = vmatprep.subr.bf16.mxu1 %v1744_v34  ;;  %v656_v5 = vld [vmem:[#allocation3 + $0x3b0] sm:$0xff]  ;;  %v657_v21 = vld [vmem:[#allocation3 + $0x3b8] sm:$0xff]  ;;  %v646_v9 = vld [vmem:[#allocation3 + $0x360] sm:$0xff] }
 0x340   :  { %1775 = vmatpush3.bf16.msra.mxu0 %v1774_v28  ;;  %v573_v28 = vld [vmem:[#allocation3 + $0x118] sm:$0xff] }
 0x341   :  { %1777 = vmatprep.subr.bf16.mxu0 %v1776_v30  ;;  %v1758_v32 = vpack.c.bf16 %v573_v28, %v572_v27 }
 0x342   :  { %1747 = vmatpush3.bf16.msra.mxu1 %v1746_v41 }
 0x343   :  { %1749 = vmatprep.subr.bf16.mxu1 %v1748_v46 }
 0x344   :  { %1779 = vmatpush3.bf16.msra.mxu0 %v1778_v40  ;;  %v1792_v40 = vpack.c.bf16 %v639_v39, %v638_v38  ;;  %v1830_v38 = vpack.c.bf16 %v657_v21, %v656_v5  ;;  %v631_v5 = vld [vmem:[#allocation3 + $0x2e8] sm:$0xff]  ;;  %v664_v21 = vld [vmem:[#allocation3 + $0x3f0] sm:$0xff] }
 0x345   :  { %1781 = vmatprep.subr.bf16.mxu0 %v1780_v42 }
 0x346   :  { %1751 = vmatpush3.bf16.msra.mxu1 %v1750_v53 }
 0x347   :  { %1753 = vmatprep.subr.bf16.mxu1 %v1752_v58 }
 0x348   :  { %1783 = vmatpush3.bf16.msra.mxu0 %v1782_v52 }
 0x349   :  { %1785 = vmatprep.subr.bf16.mxu0 %v1784_v54 }
 0x34a   :  { %1755 = vmatpush3.bf16.msra.mxu1 %v1754_v63 }
 0x34b   :  { %1757 = vmatprep.subr.bf16.mxu1 %v1756_v25 }
 0x34c   :  { %1787 = vmatpush3.bf16.msra.mxu0 %v1786_v62  ;;  %v1946_v62 = vpack.i.bf16 %v2175_v16, %v2173_v14  ;;  %v622_v14 = vld [vmem:[#allocation3 + $0x2a0] sm:$0xff] }
 0x34d   :  { %1789 = vmatprep.subr.bf16.mxu0 %v1788_v3  ;;  %v1794_v28 = vpack.c.bf16 %v623_v18, %v622_v14  ;;  %v647_v14 = vld [vmem:[#allocation3 + $0x368] sm:$0xff] }
 0x34e   :  { %1759 = vmatpush3.bf16.msra.mxu1 %v1758_v32 }
 0x34f   :  { %1793 = vmatprep.subr.bf16.mxu1 %v1792_v40  ;;  %v1832_v40 = vpack.c.bf16 %v675_v36, %v674_v35  ;;  %v666_v35 = vld [vmem:[#allocation3 + $0x400] sm:$0xff]  ;;  %v667_v36 = vld [vmem:[#allocation3 + $0x408] sm:$0xff] }
 0x350   :  { %1791 = vmatpush3.bf16.msra.mxu0 %v1790_v31 }
 0x351   :  { %1825 = vmatprep.subr.bf16.mxu0 %v1824_v37  ;;  %v643_v37 = vld [vmem:[#allocation3 + $0x348] sm:$0xff] }
 0x406   :  { %v1623_v24 = vpop.f32.mrb[0].mxu0 }
 0x407   :  { %v481_v29 = vadd.f32 %v1623_v24, %v395_v13  ;;  %v475_v30 = vpop.f32.mrb[1].mxu0 }
 0x408   :  { %v476_v33 = vadd.f32 %v475_v30, %v395_v13  ;;  %v624_v30 = vld [vmem:[#allocation3 + $0x2b0] sm:$0xff] }
 0x409   :  { %v495_v34 = vmax.f32 %v481_v29, 0.0  ;;  %v1828_v29 = vpack.c.bf16 %v673_v22, %v672_v19  ;;  %v662_v22 = vld [vmem:[#allocation3 + $0x3e0] sm:$0xff] }
 0x40a   :  { %v494_v15 = vmax.f32 %v476_v33, 0.0 }
 0x40b   :  { %499 = vst.msk [vmem:[#allocation2 + $0x8] sm:$0xff] %vm375_vm7, %v495_v34  ;;  %v625_v34 = vld [vmem:[#allocation3 + $0x2b8] sm:$0xff] }
 0x40c   :  { %498 = vst.msk [vmem:[#allocation2] sm:$0xff] %vm375_vm7, %v494_v15  ;;  %v642_v15 = vld [vmem:[#allocation3 + $0x340] sm:$0xff]  ;;  %v1798_v39 = vpack.c.bf16 %v625_v34, %v624_v30 }
 0x40d   :  { %v650_v30 = vld [vmem:[#allocation3 + $0x380] sm:$0xff] }
 0x40e   :  { %v1626_v41 = vpop.f32.mrb[2].mxu0 }
 0x40f   :  { %v491_v42 = vadd.f32 %v1626_v41, %v395_v13  ;;  %v485_v43 = vpop.f32.mrb[3].mxu0  ;;  %v658_v41 = vld [vmem:[#allocation3 + $0x3c0] sm:$0xff] }
 0x410   :  { %v486_v44 = vadd.f32 %v485_v43, %v395_v13  ;;  %v640_v13 = vld [vmem:[#allocation3 + $0x330] sm:$0xff]  ;;  %v626_v43 = vld [vmem:[#allocation3 + $0x2c0] sm:$0xff] }
 0x411   :  { %v497_v45 = vmax.f32 %v491_v42, 0.0  ;;  %v1796_v33 = vpack.c.bf16 %v641_v6, %v640_v13  ;;  %v659_v42 = vld [vmem:[#allocation3 + $0x3c8] sm:$0xff]  ;;  %v680_v13 = vld [vmem:[#allocation3 + $0x470] sm:$0xff]  ;;  %v681_v6 = vld [vmem:[#allocation3 + $0x478] sm:$0xff] }
 0x412   :  { %v496_v46 = vmax.f32 %v486_v44, 0.0  ;;  %v507_v47 = vld [vmem:[#allocation2 + $0xa] sm:$0x3]  ;;  %v509_v48 = vld [vmem:[#allocation2 + $0xe] sm:$0x3] }
 0x413   :  { %501 = vst.msk [vmem:[#allocation2 + $0x18] sm:$0xff] %vm375_vm7, %v497_v45  ;;  %v1916_v49 = vpack.i.bf16 %v507_v47, %v509_v48  ;;  %v503_v50 = vld [vmem:[#allocation2 + $0x2] sm:$0x3]  ;;  %v505_v51 = vld [vmem:[#allocation2 + $0x6] sm:$0x3]  ;;  %v1800_v45 = vpack.c.bf16 %v643_v37, %v642_v15  ;;  %v676_v47 = vld [vmem:[#allocation3 + $0x450] sm:$0xff] }
 0x414   :  { %500 = vst.msk [vmem:[#allocation2 + $0x10] sm:$0xff] %vm375_vm7, %v496_v46  ;;  %v1911_v52 = vpack.i.bf16 %v503_v50, %v505_v51  ;;  %v508_v11 = vld [vmem:[#allocation2 + $0xc] sm:$0x3]  ;;  %v506_v12 = vld [vmem:[#allocation2 + $0x8] sm:$0x3]  ;;  %v677_v48 = vld [vmem:[#allocation3 + $0x458] sm:$0xff] }
 0x415   :  { %1917 = vrot.lane.b32.xlu0 %v1916_v49, %s2055_s28  ;;  %v504_v25 = vld [vmem:[#allocation2 + $0x4] sm:$0x3]  ;;  %v502_v27 = vld [vmem:[#allocation2] sm:$0x3]  ;;  %v627_v46 = vld [vmem:[#allocation3 + $0x2c8] sm:$0xff] }
 0x416   :  { %1912 = vrot.lane.b32.xlu1 %v1911_v52, %s2055_s28  ;;  %v644_v51 = vld [vmem:[#allocation3 + $0x350] sm:$0xff]  ;;  %v645_v52 = vld [vmem:[#allocation3 + $0x358] sm:$0xff]  ;;  %v634_v15 = vld [vmem:[#allocation3 + $0x300] sm:$0xff] }
 0x41a   :  { %v515_v53 = vld [vmem:[#allocation2 + $0x1a] sm:$0x3]  ;;  %v517_v54 = vld [vmem:[#allocation2 + $0x1e] sm:$0x3] }
 0x41b   :  { %v1926_v55 = vpack.i.bf16 %v515_v53, %v517_v54  ;;  %v511_v56 = vld [vmem:[#allocation2 + $0x12] sm:$0x3]  ;;  %v513_v57 = vld [vmem:[#allocation2 + $0x16] sm:$0x3]  ;;  %v516_v54 = vld [vmem:[#allocation2 + $0x1c] sm:$0x3] }
 0x41c   :  { %v1921_v58 = vpack.i.bf16 %v511_v56, %v513_v57  ;;  %v660_v56 = vld [vmem:[#allocation3 + $0x3d0] sm:$0xff] }
 0x41d   :  { %1927 = vrot.lane.b32.xlu0 %v1926_v55, %s2055_s28  ;;  %v1834_v55 = vpack.c.bf16 %v659_v42, %v658_v41  ;;  %v652_v41 = vld [vmem:[#allocation3 + $0x390] sm:$0xff]  ;;  %v653_v42 = vld [vmem:[#allocation3 + $0x398] sm:$0xff] }
 0x41e   :  { %1922 = vrot.lane.b32.xlu1 %v1921_v58, %s2055_s28  ;;  %v512_v58 = vld [vmem:[#allocation2 + $0x14] sm:$0x3] }
 0x421   :  { %1937 = vrot.lane.b32.xlu0 %v1936_v60, %s2055_s28  ;;  %v1836_v60 = vpack.c.bf16 %v677_v48, %v676_v47  ;;  %v668_v47 = vld [vmem:[#allocation3 + $0x410] sm:$0xff]  ;;  %v669_v48 = vld [vmem:[#allocation3 + $0x418] sm:$0xff] }
 0x422   :  { %1932 = vrot.lane.b32.xlu1 %v1931_v59, %s2055_s28  ;;  %v1802_v59 = vpack.c.bf16 %v627_v46, %v626_v43  ;;  %v1850_v43 = vpack.c.bf16 %v667_v36, %v666_v35  ;;  %v1129_v35 = vld [vmem:[#allocation3 + $0x78] sm:$0xff]  ;;  %v1130_v36 = vld [vmem:[#allocation3 + $0x80] sm:$0xff] }
 0x425   :  { %1947 = vrot.lane.b32.xlu0 %v1946_v62, %s2055_s28  ;;  %v628_v62 = vld [vmem:[#allocation3 + $0x2d0] sm:$0xff] }
 0x426   :  { %1942 = vrot.lane.b32.xlu1 %v1941_v61, %s2055_s28  ;;  %v661_v61 = vld [vmem:[#allocation3 + $0x3d8] sm:$0xff] }
 0x429   :  { %1957 = vrot.lane.b32.xlu0 %v1956_v1, %s2055_s28  ;;  %v1804_v1 = vpack.c.bf16 %v645_v52, %v644_v51  ;;  %v636_v51 = vld [vmem:[#allocation3 + $0x310] sm:$0xff]  ;;  %v637_v52 = vld [vmem:[#allocation3 + $0x318] sm:$0xff] }
 0x42a   :  { %1952 = vrot.lane.b32.xlu1 %v1951_v0, %s2055_s28 }
 0x42d   :  { %1967 = vrot.lane.b32.xlu0 %v1966_v4, %s2055_s28  ;;  %v678_v4 = vld [vmem:[#allocation3 + $0x460] sm:$0xff] }
 0x42e   :  { %1962 = vrot.lane.b32.xlu1 %v1961_v2, %s2055_s28  ;;  %v629_v2 = vld [vmem:[#allocation3 + $0x2d8] sm:$0xff]  ;;  %v1840_v19 = vpack.c.bf16 %v679_v8, %v678_v4 }
 0x42f   :  { %v1806_v18 = vpack.c.bf16 %v629_v2, %v628_v62 }
 0x487   :  { %v1918_v16 = vpop.permute.xlu0 %1917 }
 0x488   :  { %v1920_v23 = vunpack.i.h.bf16 %v1918_v16  ;;  %v1919_v63 = vunpack.i.l.bf16 %v1918_v16  ;;  %v1913_v3 = vpop.permute.xlu1 %1912  ;;  %v1838_v16 = vpack.c.bf16 %v661_v61, %v660_v56 }
 0x489   :  { %v1915_v7 = vunpack.i.h.bf16 %v1913_v3  ;;  %v1914_v17 = vunpack.i.l.bf16 %v1913_v3  ;;  %v1808_v3 = vpack.c.bf16 %v647_v14, %v646_v9 }
 0x48a   :  { %v553_v24 = vsel %vm375_vm7, %v508_v11, %v1919_v63  ;;  %v552_v26 = vsel %vm375_vm7, %v506_v12, %v1920_v23  ;;  %v663_v23 = vld [vmem:[#allocation3 + $0x3e8] sm:$0xff]  ;;  %v630_v63 = vld [vmem:[#allocation3 + $0x2e0] sm:$0xff] }
 0x48b   :  { %824 = vmatprep.mubr.f32.mxu0 %v553_v24  ;;  %v551_v31 = vsel %vm375_vm7, %v504_v25, %v1914_v17  ;;  %v550_v32 = vsel %vm375_vm7, %v502_v27, %v1915_v7  ;;  %v648_v7 = vld [vmem:[#allocation3 + $0x370] sm:$0xff]  ;;  %v649_v17 = vld [vmem:[#allocation3 + $0x378] sm:$0xff]  ;;  %v1842_v11 = vpack.c.bf16 %v663_v23, %v662_v22  ;;  %v1810_v12 = vpack.c.bf16 %v631_v5, %v630_v63 }
 0x48c   :  { %754 = vmatprep.mubr.f32.mxu1 %v551_v31  ;;  %825 = vmatmul.mubr.f32.vlgmr.msra.gmra.mrb[4].mxu0 %v552_v26  ;;  %v665_v24 = vld [vmem:[#allocation3 + $0x3f8] sm:$0xff]  ;;  %v632_v25 = vld [vmem:[#allocation3 + $0x2f0] sm:$0xff]  ;;  %v1812_v26 = vpack.c.bf16 %v649_v17, %v648_v7  ;;  %v651_v31 = vld [vmem:[#allocation3 + $0x388] sm:$0xff] }
 0x48d   :  { %1827 = vmatpush3.bf16.msra.mxu0 %v1826_v20  ;;  %755 = vmatmul.mubr.f32.vlgmr.msra.gmra.mrb[8].mxu1 %v550_v32  ;;  %v1844_v20 = vpack.c.bf16 %v681_v6, %v680_v13  ;;  %v633_v27 = vld [vmem:[#allocation3 + $0x2f8] sm:$0xff]  ;;  %v1846_v32 = vpack.c.bf16 %v665_v24, %v664_v21  ;;  %v1816_v37 = vpack.c.bf16 %v651_v31, %v650_v30  ;;  %v1126_v30 = vld [vmem:[#allocation3 + $0x60] sm:$0xff]  ;;  %v1127_v31 = vld [vmem:[#allocation3 + $0x68] sm:$0xff] }
 0x48e   :  { %1795 = vmatpush3.bf16.msra.mxu1 %v1794_v28  ;;  %1829 = vmatprep.subr.bf16.mxu0 %v1828_v29  ;;  %v682_v28 = vld [vmem:[#allocation3 + $0x480] sm:$0xff]  ;;  %v683_v29 = vld [vmem:[#allocation3 + $0x488] sm:$0xff] }
 0x48f   :  { %v2259_v44 = vpop.permute.xlu0 %1927  ;;  %1797 = vmatprep.subr.bf16.mxu1 %v1796_v33  ;;  %v1814_v33 = vpack.c.bf16 %v633_v27, %v632_v25  ;;  %v1848_v34 = vpack.c.bf16 %v683_v29, %v682_v28  ;;  %v2060_v29 = vmov 0.0  }
 0x490   :  { %v1929_v49 = vunpack.i.l.bf16 %v2259_v44  ;;  %v2262_v50 = vpop.permute.xlu1 %1922 }
 0x491   :  { %1831 = vmatpush3.bf16.msra.mxu0 %v1830_v38  ;;  %v1924_v53 = vunpack.i.l.bf16 %v2262_v50  ;;  %v635_v38 = vld [vmem:[#allocation3 + $0x308] sm:$0xff]  ;;  %v1925_v56 = vunpack.i.h.bf16 %v2262_v50 }
 0x492   :  { %1799 = vmatpush3.bf16.msra.mxu1 %v1798_v39  ;;  %1833 = vmatprep.subr.bf16.mxu0 %v1832_v40  ;;  %v557_v57 = vsel %vm375_vm7, %v516_v54, %v1929_v49  ;;  %v684_v39 = vld [vmem:[#allocation3 + $0x490] sm:$0xff]  ;;  %v685_v40 = vld [vmem:[#allocation3 + $0x498] sm:$0xff]  ;;  %v1820_v49 = vpack.c.bf16 %v653_v42, %v652_v41  ;;  %v1822_v54 = vpack.c.bf16 %v637_v52, %v636_v51  ;;  %v688_v42 = vsub.s32 3, %v2116_v10 }
 0x493   :  { %964 = vmatprep.mubr.f32.mxu0 %v557_v57  ;;  %1801 = vmatprep.subr.bf16.mxu1 %v1800_v45  ;;  %v555_v0 = vsel %vm375_vm7, %v512_v58, %v1924_v53  ;;  %v1818_v45 = vpack.c.bf16 %v635_v38, %v634_v15  ;;  %v1852_v46 = vpack.c.bf16 %v685_v40, %v684_v39  ;;  %v514_v57 = vld [vmem:[#allocation2 + $0x18] sm:$0x3]  ;;  %v1938_v62 = vpop.permute.xlu0 %1937  ;;  %v1131_v15 = vld [vmem:[#allocation3 + $0x88] sm:$0xff]  ;;  %v1132_v38 = vld [vmem:[#allocation3 + $0x90] sm:$0xff] }
 0x494   :  { %894 = vmatprep.mubr.f32.mxu1 %v555_v0  ;;  %v1854_v53 = vpack.c.bf16 %v669_v48, %v668_v47  ;;  %v1933_v61 = vpop.permute.xlu1 %1932  ;;  %v1940_v2 = vunpack.i.h.bf16 %v1938_v62  ;;  %v1939_v4 = vunpack.i.l.bf16 %v1938_v62  ;;  %v1133_v39 = vld [vmem:[#allocation3 + $0x98] sm:$0xff]  ;;  %v1981_v40 = vpack.i.bf16 %v1131_v15, %v1130_v36 }
 0x495   :  { %1835 = vmatpush3.bf16.msra.mxu0 %v1834_v55  ;;  %v1930_v55 = vunpack.i.h.bf16 %v2259_v44  ;;  %v1935_v0 = vunpack.i.h.bf16 %v1933_v61  ;;  %v2058_v44 = vmov 0.0|0.0   ;;  %v1986_v41 = vpack.i.bf16 %v1133_v39, %v1132_v38  ;;  %v2288_v47 = vld [vmem:[%s2320_s2] sm:$0xff]  ;;  %s2062_s2 = smov 48  }
 0x496   :  { %1803 = vmatpush3.bf16.msra.mxu1 %v1802_v59  ;;  %1837 = vmatprep.subr.bf16.mxu0 %v1836_v60  ;;  %v510_v59 = vld [vmem:[#allocation2 + $0x10] sm:$0x3]  ;;  %v1860_v9 = vpack.c.bf16 %v1940_v2, %v1939_v4  ;;  %v689_v48 = vrot.slane %v2288_v47, %v688_v42  ;;  %v1246_v38 = vsub.s32 6, %v2116_v10 }
 0x497   :  { %1805 = vmatprep.subr.bf16.mxu1 %v1804_v1  ;;  %v556_v58 = vsel %vm375_vm7, %v514_v57, %v1930_v55  ;;  %v554_v60 = vsel %vm375_vm7, %v510_v59, %v1925_v56  ;;  %v1934_v1 = vunpack.i.l.bf16 %v1933_v61 }
 0x498   :  { %v1943_v8 = vpop.permute.xlu1 %1942 }
 0x499   :  { %1839 = vmatpush3.bf16.msra.mxu0 %v1838_v16  ;;  %v1857_v50 = vpack.c.bf16 %v1935_v0, %v1934_v1  ;;  %v1945_v14 = vunpack.i.h.bf16 %v1943_v8  ;;  %v1944_v16 = vunpack.i.l.bf16 %v1943_v8 }
 0x49a   :  { %1807 = vmatpush3.bf16.msra.mxu1 %v1806_v18  ;;  %1841 = vmatprep.subr.bf16.mxu0 %v1840_v19  ;;  %v1948_v18 = vpop.permute.xlu0 %1947 }
 0x49b   :  { %1809 = vmatprep.subr.bf16.mxu1 %v1808_v3  ;;  %v1863_v19 = vpack.c.bf16 %v1945_v14, %v1944_v16  ;;  %v1950_v22 = vunpack.i.h.bf16 %v1948_v18  ;;  %v1949_v23 = vunpack.i.l.bf16 %v1948_v18 }
 0x49c   :  { %v1953_v63 = vpop.permute.xlu1 %1952 }
 0x49d   :  { %1843 = vmatpush3.bf16.msra.mxu0 %v1842_v11  ;;  %v1866_v3 = vpack.c.bf16 %v1950_v22, %v1949_v23  ;;  %v1955_v5 = vunpack.i.h.bf16 %v1953_v63  ;;  %v1954_v13 = vunpack.i.l.bf16 %v1953_v63 }
 0x49e   :  { %1811 = vmatpush3.bf16.msra.mxu1 %v1810_v12  ;;  %1845 = vmatprep.subr.bf16.mxu0 %v1844_v20  ;;  %v1958_v6 = vpop.permute.xlu0 %1957 }
 0x49f   :  { %1813 = vmatprep.subr.bf16.mxu1 %v1812_v26  ;;  %v1869_v7 = vpack.c.bf16 %v1955_v5, %v1954_v13  ;;  %v1960_v17 = vunpack.i.h.bf16 %v1958_v6  ;;  %v1959_v11 = vunpack.i.l.bf16 %v1958_v6  ;;  %v989_v6 = vsub.s32 4, %v2116_v10 }
 0x4a0   :  { %v1963_v12 = vpop.permute.xlu1 %1962 }
 0x4a1   :  { %1847 = vmatpush3.bf16.msra.mxu0 %v1846_v32  ;;  %v1872_v20 = vpack.c.bf16 %v1960_v17, %v1959_v11  ;;  %v1965_v21 = vunpack.i.h.bf16 %v1963_v12  ;;  %v1964_v24 = vunpack.i.l.bf16 %v1963_v12  ;;  %v1128_v32 = vld [vmem:[#allocation3 + $0x70] sm:$0xff]  ;;  %v990_v17 = vrot.slane %v2288_v47, %v989_v6 }
 0x4a2   :  { %1815 = vmatpush3.bf16.msra.mxu1 %v1814_v33  ;;  %1849 = vmatprep.subr.bf16.mxu0 %v1848_v34  ;;  %v1968_v26 = vpop.permute.xlu0 %1967  ;;  %v1971_v34 = vpack.i.bf16 %v1127_v31, %v1126_v30 }
 0x4a3   :  { %1817 = vmatprep.subr.bf16.mxu1 %v1816_v37  ;;  %v1875_v25 = vpack.c.bf16 %v1965_v21, %v1964_v24  ;;  %v1970_v27 = vunpack.i.h.bf16 %v1968_v26  ;;  %v1969_v28 = vunpack.i.l.bf16 %v1968_v26  ;;  %v1976_v37 = vpack.i.bf16 %v1129_v35, %v1128_v32 }
 0x4a4   :  { %1972 = vrot.lane.b32.xlu1 %v1971_v34, %s2061_s10  ;;  %v1136_v32 = vsub.s32 5, %v2116_v10 }
 0x4a5   :  { %1851 = vmatpush3.bf16.msra.mxu0 %v1850_v43  ;;  %v1878_v33 = vpack.c.bf16 %v1970_v27, %v1969_v28  ;;  %1977 = vrot.lane.b32.xlu0 %v1976_v37, %s2061_s10  ;;  %v2063_v37 = vmov 0  }
 0x4a6   :  { %1819 = vmatpush3.bf16.msra.mxu1 %v1818_v45  ;;  %1853 = vmatprep.subr.bf16.mxu0 %v1852_v46 }
 0x4a7   :  { %1821 = vmatprep.subr.bf16.mxu1 %v1820_v49  ;;  %2001 = vset.pattern.permute.xlu1 %v2063_v37 }
 0x4a8   :  { %1982 = vrot.lane.b32.xlu1 %v1981_v40, %s2061_s10  ;;  %2002 = vset.pattern.permute.xlu0 %v2063_v37 }
 0x4a9   :  { %1855 = vmatpush3.bf16.msra.mxu0 %v1854_v53  ;;  %1987 = vrot.lane.b32.xlu0 %v1986_v41, %s2061_s10 }
 0x4aa   :  { %1823 = vmatpush3.bf16.msra.mxu1 %v1822_v54  ;;  %1880 = vmatprep.subr.bf16.mxu0 %v2058_v44 }
 0x4ab   :  { %1856 = vmatprep.subr.bf16.mxu1 %v2058_v44 }
 0x4ac   :  { %965 = vmatmul.mubr.f32.vlgmr.msra.gmra.mrb[6].mxu0 %v556_v58  ;;  %1992 = vrot.lane.b32.xlu1 %v1981_v40, %s2062_s2 }
 0x4ad   :  { %895 = vmatmul.mubr.f32.vlgmr.msra.gmra.mrb[10].mxu1 %v554_v60  ;;  %1678 = vmatprep.mubr.msk.f32.mxu0 %vm2059_vm9, %v2060_v29 }
 0x4ae   :  { %1858 = vmatpush3.bf16.msra.mxu1 %v1857_v50  ;;  %1659 = vmatprep.mubr.msk.f32.mxu1 %vm2059_vm9, %v2060_v29 }
 0x4af   :  { %1859 = vmatprep.subr.bf16.mxu1 %v2058_v44  ;;  %1997 = vrot.lane.b32.xlu0 %v1986_v41, %s2062_s2 }
 0x4b2   :  { %1861 = vmatpush3.bf16.msra.mxu1 %v1860_v9 }
 0x4b3   :  { %1862 = vmatprep.subr.bf16.mxu1 %v2058_v44 }
 0x4b6   :  { %1864 = vmatpush3.bf16.msra.mxu1 %v1863_v19 }
 0x4b7   :  { %1865 = vmatprep.subr.bf16.mxu1 %v2058_v44 }
 0x4ba   :  { %1867 = vmatpush3.bf16.msra.mxu1 %v1866_v3 }
 0x4bb   :  { %1868 = vmatprep.subr.bf16.mxu1 %v2058_v44 }
 0x4be   :  { %1870 = vmatpush3.bf16.msra.mxu1 %v1869_v7 }
 0x4bf   :  { %1871 = vmatprep.subr.bf16.mxu1 %v2058_v44 }
 0x4c2   :  { %1873 = vmatpush3.bf16.msra.mxu1 %v1872_v20 }
 0x4c3   :  { %1874 = vmatprep.subr.bf16.mxu1 %v2058_v44 }
 0x4c6   :  { %1876 = vmatpush3.bf16.msra.mxu1 %v1875_v25 }
 0x4c7   :  { %1877 = vmatprep.subr.bf16.mxu1 %v2058_v44 }
 0x4ca   :  { %1879 = vmatpush3.bf16.msra.mxu1 %v1878_v33  ;;  %v1137_v33 = vrot.slane %v2288_v47, %v1136_v32 }
 0x516   :  { %v1973_v56 = vpop.permute.xlu1 %1972 }
 0x517   :  { %v1975_v59 = vunpack.i.h.bf16 %v1973_v56  ;;  %v1974_v60 = vunpack.i.l.bf16 %v1973_v56  ;;  %v1978_v0 = vpop.permute.xlu0 %1977 }
 0x518   :  { %v1980_v4 = vunpack.i.h.bf16 %v1978_v0  ;;  %v1979_v50 = vunpack.i.l.bf16 %v1978_v0 }
 0x519   :  { %v1881_v2 = vpack.c.bf16 %v1975_v59, %v1974_v60 }
 0x51a   :  { %v1983_v8 = vpop.permute.xlu1 %1982  ;;  %v1884_v14 = vpack.c.bf16 %v1980_v4, %v1979_v50 }
 0x51b   :  { %1882 = vmatpush3.bf16.msra.mxu0 %v1881_v2  ;;  %v1985_v16 = vunpack.i.h.bf16 %v1983_v8  ;;  %v1984_v18 = vunpack.i.l.bf16 %v1983_v8  ;;  %v1988_v19 = vpop.permute.xlu0 %1987 }
 0x51c   :  { %1883 = vmatprep.subr.bf16.mxu0 %v2058_v44  ;;  %v1990_v3 = vunpack.i.h.bf16 %v1988_v19  ;;  %v1989_v5 = vunpack.i.l.bf16 %v1988_v19 }
 0x51d   :  { %v1887_v63 = vpack.c.bf16 %v1985_v16, %v1984_v18 }
 0x51e   :  { %v1890_v13 = vpack.c.bf16 %v1990_v3, %v1989_v5  ;;  %v1993_v7 = vpop.permute.xlu1 %1992 }
 0x51f   :  { %1885 = vmatpush3.bf16.msra.mxu0 %v1884_v14  ;;  %v1995_v11 = vunpack.i.h.bf16 %v1993_v7  ;;  %v1994_v12 = vunpack.i.l.bf16 %v1993_v7 }
 0x520   :  { %1886 = vmatprep.subr.bf16.mxu0 %v2058_v44 }
 0x521   :  { %v1998_v20 = vpop.permute.xlu0 %1997  ;;  %v1893_v26 = vpack.c.bf16 %v1995_v11, %v1994_v12 }
 0x522   :  { %v2000_v27 = vunpack.i.h.bf16 %v1998_v20  ;;  %v1999_v28 = vunpack.i.l.bf16 %v1998_v20 }
 0x523   :  { %1888 = vmatpush3.bf16.msra.mxu0 %v1887_v63 }
 0x524   :  { %1889 = vmatprep.subr.bf16.mxu0 %v2058_v44  ;;  %v1896_v31 = vpack.c.bf16 %v2000_v27, %v1999_v28 }
 0x527   :  { %1891 = vmatpush3.bf16.msra.mxu0 %v1890_v13 }
 0x528   :  { %1892 = vmatprep.subr.bf16.mxu0 %v2058_v44 }
 0x55f   :  { %v1467_v43 = vpop.f32.mrb[4].mxu0 }
 0x560   :  { %v1432_v45 = vpop.f32.mrb[8].mxu1  ;;  %v1468_v46 = vpop.f32.mrb[5].mxu0 }
 0x561   :  { %v1469_v49 = vadd.f32 %v1468_v46, %v1467_v43  ;;  %v1433_v51 = vpop.f32.mrb[9].mxu1 }
 0x562   :  { %v1434_v52 = vadd.f32 %v1433_v51, %v1432_v45 }
 0x564   :  { %v757_v53 = vadd.f32 %v1434_v52, %v689_v48 }
 0x566   :  { %v827_v54 = vadd.f32 %v1469_v49, %v757_v53 }
 0x57f   :  { %v1537_v55 = vpop.f32.mrb[6].mxu0 }
 0x580   :  { %v1502_v57 = vpop.f32.mrb[10].mxu1  ;;  %v1538_v58 = vpop.f32.mrb[7].mxu0 }
 0x581   :  { %v1539_v61 = vadd.f32 %v1538_v58, %v1537_v55  ;;  %v1503_v62 = vpop.f32.mrb[11].mxu1 }
 0x582   :  { %v1504_v1 = vadd.f32 %v1503_v62, %v1502_v57 }
 0x584   :  { %v897_v9 = vadd.f32 %v1504_v1, %v827_v54 }
 0x586   :  { %v967_v22 = vadd.f32 %v1539_v61, %v897_v9 }
 0x588   :  { %v970_v23 = vmax.f32 %v967_v22, 0.0 }
 0x58a   :  { %1660 = vmatmul.mubr.f32.vlgmr.msra.gmra.mrb[12].mxu1 %v970_v23 }
 0x65d   :  { %v1121_v21 = vpop.f32.mrb[12].mxu1 }
 0x65e   :  { %v1122_v24 = vadd.f32 %v1121_v21, %v990_v17  ;;  %v1661_v25 = vpop.f32.mrb[13].mxu1 }
 0x660   :  { %v1125_v30 = vmax.f32 %v1122_v24, 0.0 }
 0x662   :  { %1679 = vmatmul.mubr.msk.f32.vlgmr.msra.gmra.mrb[8].mxu0 %vm375_vm7, %v1125_v30 }
 0x663   :  { %1894 = vmatpush3.bf16.msra.mxu0 %v1893_v26  ;;  %1689 = vmatprep.mubr.msk.f32.mxu0 %vm2059_vm9, %v2060_v29  ;;  %v1247_v29 = vrot.slane %v2288_v47, %v1246_v38 }
 0x664   :  { %1895 = vmatprep.subr.bf16.mxu0 %v2058_v44 }
 0x667   :  { %1897 = vmatpush3.bf16.msra.mxu0 %v1896_v31 }
 0x735   :  { %v1239_v34 = vpop.f32.mrb[8].mxu0 }
 0x736   :  { %v1240_v35 = vadd.f32 %v1239_v34, %v1137_v33  ;;  %v1680_v36 = vpop.f32.mrb[9].mxu0 }
 0x738   :  { %v1243_v15 = vmax.f32 %v1240_v35, 0.0 }
 0x73a   :  { %1690 = vmatmul.mubr.msk.f32.vlgmr.msra.gmra.mrb[10].mxu0 %vm204_vm5, %v1243_v15 }
 0x80d   :  { %v1329_v39 = vpop.f32.mrb[10].mxu0 }
 0x80e   :  { %v1330_v44 = vadd.f32 %v1329_v39, %v1247_v29  ;;  %v1691_v40 = vpop.f32.mrb[11].mxu0 }
 0x810   :  { %1335 = vperm.xlu1 %2001, %v1330_v44  }
 0x88f   :  { %v1336_v41 = vpop.permute.xlu1 %1335 }
 0x890   :  { %1338 = vst [vmem:[#allocation6] sm:$0x3] %v1336_v41 }
 0x891   :  { %2037 = shalt.err (!%p2034_p12)
}
 0x892   :  { %s2038_s18 = scalar_lea.hbm %s2321_s3, 32 }
 0x893   :  { %p2039_p13 = scmp.ne.s32.totalorder %s2321_s3, %s2038_s18  ;;  %p2042_p0 = scmp.lt.u32.totalorder %s2038_s18, %s2321_s3 }
 0x895   :  { %p2044_p1 = pnand %p2042_p0, %p2039_p13 }
 0x897   :  { %2047 = shalt.err (!%p2044_p1)
}
 0x898   :  { %1348 = dma.vmem_to_hbm [thread:$0]  %s1346_s14, 32, %s2321_s3, [#allocation5]  }
 0x899   :  { %2050 = dma.done.wait [#allocation5], 32  }
 0x89a   :  { %2051 = vsyncadd [#allocation5], 4294967264 }
 0x89b   :  { %1352 = vsyncpa [#allocation4], 1 }
 0x89c   :  { %1353 = vsyncpa [#allocation5], 1 }

</bundles_post_ra>
